<compile_context>
chip_gen: v7x
topology: tpu7x:2x2x1
jax: 0.10.0
libtpu: 0.0.40
codegen_flags: <defaults>
</compile_context>

<pallas_src>
import jax
import jax.numpy as jnp
from jax import lax
from jax.experimental import pallas as pl
from jax.experimental.pallas import tpu as pltpu

NEG_INF = -1e30                      # finite "-inf" for padded vocab columns


def _round_up(x, m):
    return (x + m - 1) // m * m


def _vmem_limit_bytes():
    # Generation-aware scoped-VMEM budget (~75% of physical), fallback 32 MiB.
    try:
        cap = int(pltpu.get_tpu_info().vmem_capacity_bytes)
    except Exception:
        cap = 64 * 1024 * 1024
    return max(32 * 1024 * 1024, (cap * 3) // 4)


# ---------------------------------------------------------------------------
# Kernel A: the small 5-matmul MLP, once per T tile.  grid = (nT,).
# Emits h in bf16 (ready for the MXU in the vocab sweep).
# ---------------------------------------------------------------------------
def mlp_kernel(
    emb_ref,                                    # (tT, dim_p)  f32
    w0_ref, b0_ref,                             # (dim_p, dim_p) bf16, (1, dim_p) f32
    w1a_ref, b1a_ref, w1b_ref, b1b_ref,         # ResLayer 1
    w2a_ref, b2a_ref, w2b_ref, b2b_ref,         # ResLayer 2
    h_ref,                                      # (tT, dim_p)  bf16
):
    def dot(a, w_ref):
        # bf16 operands -> MXU fast path, f32 accumulation.
        return jnp.dot(a.astype(jnp.bfloat16), w_ref[...],
                       preferred_element_type=jnp.float32)

    x = emb_ref[...]
    h = dot(x, w0_ref) + b0_ref[...]
    # ResLayer 1
    t = jnp.maximum(dot(h, w1a_ref) + b1a_ref[...], 0.0)
    t = jnp.maximum(dot(t, w1b_ref) + b1b_ref[...], 0.0)
    h = h + t
    # ResLayer 2
    t = jnp.maximum(dot(h, w2a_ref) + b2a_ref[...], 0.0)
    t = jnp.maximum(dot(t, w2b_ref) + b2b_ref[...], 0.0)
    h = h + t
    h_ref[...] = h.astype(h_ref.dtype)


# ---------------------------------------------------------------------------
# Kernel B: single-pass vocab sweep.  grid = (nT, nV), T "parallel", V
# innermost "arbitrary".  The (tT, V_p) output block stays resident across the
# V axis: each step writes its raw logits tile and updates the online (m, l);
# the last step subtracts the log-sum-exp in place -> log-probs.
# ---------------------------------------------------------------------------
def lse_logits_kernel(
    h_ref,                                      # (tT, dim_p)  bf16
    w3_ref,                                     # (tV, dim_p)  bf16  (pre-transposed)
    b3_ref,                                     # (1, tV)      f32
    out_ref,                                    # (tT, V_p)    f32  (resident)
    m_sc, l_sc,                                 # (tT, 1)      f32 scratch
):
    v = pl.program_id(1)
    nv = pl.num_programs(1)
    tV = w3_ref.shape[0]

    @pl.when(v == 0)
    def _init():
        m_sc[...] = jnp.full(m_sc.shape, NEG_INF, m_sc.dtype)
        l_sc[...] = jnp.zeros(l_sc.shape, l_sc.dtype)

    # (tT, dim) x (tV, dim) contracted over dim -> (tT, tV), f32 accumulation.
    logits = lax.dot_general(
        h_ref[...], w3_ref[...],
        dimension_numbers=(((1,), (1,)), ((), ())),
        preferred_element_type=jnp.float32) + b3_ref[...]

    # Lane-dense store of raw logits into the resident output row-block.
    off = pl.multiple_of(v * tV, 128)
    out_ref[:, pl.ds(off, tV)] = logits

    # Online max / sum-exp update (f32 throughout).
    m_new = jnp.maximum(m_sc[...], jnp.max(logits, axis=-1, keepdims=True))
    l_sc[...] = (l_sc[...] * jnp.exp(m_sc[...] - m_new)
                 + jnp.sum(jnp.exp(logits - m_new), axis=-1, keepdims=True))
    m_sc[...] = m_new

    @pl.when(v == nv - 1)
    def _finalize():
        lse = m_sc[...] + jnp.log(l_sc[...])
        out_ref[...] = out_ref[...] - lse


# ---------------------------------------------------------------------------
# Wrapper: padding, tiling, two pallas_calls (tiny MLP + fused vocab sweep).
# ---------------------------------------------------------------------------
def term_parameterizer_forward(params, *, v_tile=1024, t_tile=128):
    f32, bf16 = jnp.float32, jnp.bfloat16
    vmem_limit = _vmem_limit_bytes()

    emb = params["term_emb"]
    T, dim = emb.shape
    V = params["w3"].shape[1]

    dim_p = _round_up(dim, 128)
    tV = min(_round_up(v_tile, 128), _round_up(V, 128))   # multiple of 128
    V_p = _round_up(V, tV)
    nV = V_p // tV

    # tT multiple of 16 (bf16 sublane packing for the h block).
    tT = min(_round_up(t_tile, 16), _round_up(T, 16))

    # Shrink tT if the resident (tT, V_p) output block would blow the VMEM
    # budget (only matters for very large vocabularies, esp. on v7x).
    def fused_bytes(tt):
        return (2 * tt * V_p * 4            # resident out block (pessimistic x2)
                + 2 * tt * dim_p * 2        # h tile, double-buffered
                + 2 * (tV * dim_p * 2 + tV * 4)   # w3/b3 tiles, double-buffered
                + 2 * tt * 128 * 4          # m/l scratch (lane-padded)
                + tt * tV * 4)              # live logits tile
    while tT > 16 and fused_bytes(tT) > int(vmem_limit * 0.85):
        tT = max(16, _round_up(tT // 2, 16))

    T_p = _round_up(T, tT)
    nT = T_p // tT

    def pad2(a, r, c, fill=0.0):
        return jnp.pad(a, ((0, r - a.shape[0]), (0, c - a.shape[1])),
                       constant_values=fill)

    emb_p = pad2(emb.astype(f32), T_p, dim_p)
    w0 = pad2(params["w0"], dim_p, dim_p).astype(bf16)
    b0 = pad2(params["b0"], 1, dim_p).astype(f32)
    w1a = pad2(params["w1a"], dim_p, dim_p).astype(bf16)
    b1a = pad2(params["b1a"], 1, dim_p).astype(f32)
    w1b = pad2(params["w1b"], dim_p, dim_p).astype(bf16)
    b1b = pad2(params["b1b"], 1, dim_p).astype(f32)
    w2a = pad2(params["w2a"], dim_p, dim_p).astype(bf16)
    b2a = pad2(params["b2a"], 1, dim_p).astype(f32)
    w2b = pad2(params["w2b"], dim_p, dim_p).astype(bf16)
    b2b = pad2(params["b2b"], 1, dim_p).astype(f32)
    # Vocab projection pre-transposed to (V_p, dim_p): contiguous row-slab DMAs.
    w3t = pad2(params["w3"].T, V_p, dim_p).astype(bf16)
    # Padded vocab columns: weight 0, bias -1e30  ->  exp() kills them exactly.
    b3 = pad2(params["b3"], 1, V_p, fill=NEG_INF).astype(f32)

    const_spec = lambda shape: pl.BlockSpec(shape, lambda t: (0, 0))

    # --- kernel A: MLP hidden state (bf16) ----------------------------------
    flops_mlp = 2 * T_p * 5 * dim_p * dim_p
    bytes_mlp = (T_p * dim_p * 4 + 5 * dim_p * dim_p * 2 + 5 * dim_p * 4
                 + T_p * dim_p * 2)
    h_bf16 = pl.pallas_call(
        mlp_kernel,
        out_shape=jax.ShapeDtypeStruct((T_p, dim_p), bf16),
        grid_spec=pltpu.PrefetchScalarGridSpec(
            num_scalar_prefetch=0,
            grid=(nT,),
            in_specs=[
                pl.BlockSpec((tT, dim_p), lambda t: (t, 0)),         # term_emb
                const_spec((dim_p, dim_p)), const_spec((1, dim_p)),  # w0, b0
                const_spec((dim_p, dim_p)), const_spec((1, dim_p)),  # w1a, b1a
                const_spec((dim_p, dim_p)), const_spec((1, dim_p)),  # w1b, b1b
                const_spec((dim_p, dim_p)), const_spec((1, dim_p)),  # w2a, b2a
                const_spec((dim_p, dim_p)), const_spec((1, dim_p)),  # w2b, b2b
            ],
            out_specs=pl.BlockSpec((tT, dim_p), lambda t: (t, 0))),
        compiler_params=pltpu.CompilerParams(
            dimension_semantics=("parallel",),
            vmem_limit_bytes=vmem_limit),
        cost_estimate=pl.CostEstimate(
            flops=flops_mlp, transcendentals=0, bytes_accessed=int(bytes_mlp)),
    )(emb_p, w0, b0, w1a, b1a, w1b, b1b, w2a, b2a, w2b, b2b)

    # --- kernel B: single-pass logits + online LSE + in-place normalize -----
    # TODO(synk): on v7x (2 TCs) a further ~2x is available by core-sharding the
    # vocab axis (pltpu.CORE_PARALLEL) with per-core partial (m, l) + a combine
    # step; with the typical single T tile this kernel runs on one TC.
    flops_vocab = 2 * T_p * dim_p * V_p
    bytes_vocab = (T_p * dim_p * 2 + dim_p * V_p * 2 + V_p * 4 + T_p * V_p * 4)
    out_p = pl.pallas_call(
        lse_logits_kernel,
        out_shape=jax.ShapeDtypeStruct((T_p, V_p), f32),
        grid_spec=pltpu.PrefetchScalarGridSpec(
            num_scalar_prefetch=0,
            grid=(nT, nV),
            in_specs=[
                pl.BlockSpec((tT, dim_p), lambda t, v: (t, 0)),      # h (bf16)
                pl.BlockSpec((tV, dim_p), lambda t, v: (v, 0)),      # w3 row slab
                pl.BlockSpec((1, tV), lambda t, v: (0, v)),          # b3 tile
            ],
            out_specs=pl.BlockSpec((tT, V_p), lambda t, v: (t, 0)),  # resident
            scratch_shapes=[
                pltpu.VMEM((tT, 1), f32),                            # running max
                pltpu.VMEM((tT, 1), f32),                            # running sum
            ]),
        compiler_params=pltpu.CompilerParams(
            dimension_semantics=("parallel", "arbitrary"),
            vmem_limit_bytes=vmem_limit),
        cost_estimate=pl.CostEstimate(
            flops=flops_vocab, transcendentals=T_p * V_p,
            bytes_accessed=int(bytes_vocab)),
    )(h_bf16, w3t, b3)

    return out_p[:T, :V]


# ---------------------------------------------------------------------------
# Parameter init (shapes mirror the PyTorch module; weights stored (in, out)).
# ---------------------------------------------------------------------------
def init_params(key, T, dim, V):
    ks = jax.random.split(key, 14)
    s = lambda fan_in: 1.0 / jnp.sqrt(fan_in)
    return {
        "term_emb": jax.random.normal(ks[0], (T, dim), jnp.float32),
        "w0":  jax.random.uniform(ks[1],  (dim, dim), jnp.float32, -s(dim), s(dim)),
        "b0":  jax.random.uniform(ks[2],  (1, dim),   jnp.float32, -s(dim), s(dim)),
        "w1a": jax.random.uniform(ks[3],  (dim, dim), jnp.float32, -s(dim), s(dim)),
        "b1a": jax.random.uniform(ks[4],  (1, dim),   jnp.float32, -s(dim), s(dim)),
        "w1b": jax.random.uniform(ks[5],  (dim, dim), jnp.float32, -s(dim), s(dim)),
        "b1b": jax.random.uniform(ks[6],  (1, dim),   jnp.float32, -s(dim), s(dim)),
        "w2a": jax.random.uniform(ks[7],  (dim, dim), jnp.float32, -s(dim), s(dim)),
        "b2a": jax.random.uniform(ks[8],  (1, dim),   jnp.float32, -s(dim), s(dim)),
        "w2b": jax.random.uniform(ks[9],  (dim, dim), jnp.float32, -s(dim), s(dim)),
        "b2b": jax.random.uniform(ks[10], (1, dim),   jnp.float32, -s(dim), s(dim)),
        "w3":  jax.random.uniform(ks[11], (dim, V),   jnp.float32, -s(dim), s(dim)),
        "b3":  jax.random.uniform(ks[12], (1, V),     jnp.float32, -s(dim), s(dim)),
    }


def reference_forward(p):
    """Pure-JAX reference with the same bf16-operand / f32-accumulate matmuls."""
    bf16 = jnp.bfloat16

    def mm(a, w):
        return jnp.dot(a.astype(bf16), w.astype(bf16),
                       preferred_element_type=jnp.float32)

    relu = lambda x: jnp.maximum(x, 0.0)
    h = mm(p["term_emb"], p["w0"]) + p["b0"]
    h = h + relu(mm(relu(mm(h, p["w1a"]) + p["b1a"]), p["w1b"]) + p["b1b"])
    h = h + relu(mm(relu(mm(h, p["w2a"]) + p["b2a"]), p["w2b"]) + p["b2b"])
    logits = mm(h, p["w3"]) + p["b3"]
    return jax.nn.log_softmax(logits, axis=-1)


if __name__ == "__main__":
    k1, k2 = jax.random.split(jax.random.PRNGKey(0))

    # Case 1: module-native small shapes (single T tile, single padded V tile).
    T, dim, V = 8, 32, 64
    params = init_params(k1, T, dim, V)
    out = jax.block_until_ready(term_parameterizer_forward(params))
    ref = reference_forward(params)
    assert out.shape == (T, V)
    assert jnp.allclose(out, ref, atol=1e-3, rtol=1e-3), "case1 mismatch vs reference"
    assert jnp.allclose(jnp.sum(jnp.exp(out), axis=-1), 1.0, atol=1e-4)

    # Case 2: ragged shapes exercising T/V tiling, online LSE and padding masks.
    T2, dim2, V2 = 40, 48, 300
    params2 = init_params(k2, T2, dim2, V2)
    out2 = jax.block_until_ready(
        term_parameterizer_forward(params2, v_tile=128, t_tile=16))
    ref2 = reference_forward(params2)
    assert out2.shape == (T2, V2)
    assert jnp.allclose(out2, ref2, atol=1e-3, rtol=1e-3), "case2 mismatch vs reference"
    assert jnp.allclose(jnp.sum(jnp.exp(out2), axis=-1), 1.0, atol=1e-4)

    # TODO(synk): norm='batch'/'layer' branches not implemented (module default norm=None);
    # word_emb/term_emb tying is parameter wiring outside the kernel.
    print("KERNEL_OK")
</pallas_src>

<mosaic_0001>
module attributes {stable_mosaic.version = 11 : i64} {
  func.func @mlp_kernel(%arg0: i32, %arg1: memref<16x128xf32, #tpu.memory_space<vmem>>, %arg2: memref<128x128xbf16, #tpu.memory_space<vmem>>, %arg3: memref<1x128xf32, #tpu.memory_space<vmem>>, %arg4: memref<128x128xbf16, #tpu.memory_space<vmem>>, %arg5: memref<1x128xf32, #tpu.memory_space<vmem>>, %arg6: memref<128x128xbf16, #tpu.memory_space<vmem>>, %arg7: memref<1x128xf32, #tpu.memory_space<vmem>>, %arg8: memref<128x128xbf16, #tpu.memory_space<vmem>>, %arg9: memref<1x128xf32, #tpu.memory_space<vmem>>, %arg10: memref<128x128xbf16, #tpu.memory_space<vmem>>, %arg11: memref<1x128xf32, #tpu.memory_space<vmem>>, %arg12: memref<16x128xbf16, #tpu.memory_space<vmem>>) attributes {dimension_semantics = [#tpu.dimension_semantics<parallel>], iteration_bounds = array<i64: 1>, scalar_prefetch = 0 : i64, scratch_operands = 0 : i64, tpu.core_type = #tpu.core_type<tc>, window_params = [{transform_indices = @transform_0, window_bounds = array<i64: 16, 128>}, {pipeline_mode = #tpu.pipeline_mode<synchronous>, transform_indices = @transform_1, window_bounds = array<i64: 128, 128>}, {pipeline_mode = #tpu.pipeline_mode<synchronous>, transform_indices = @transform_2, window_bounds = array<i64: 1, 128>}, {pipeline_mode = #tpu.pipeline_mode<synchronous>, transform_indices = @transform_3, window_bounds = array<i64: 128, 128>}, {pipeline_mode = #tpu.pipeline_mode<synchronous>, transform_indices = @transform_4, window_bounds = array<i64: 1, 128>}, {pipeline_mode = #tpu.pipeline_mode<synchronous>, transform_indices = @transform_5, window_bounds = array<i64: 128, 128>}, {pipeline_mode = #tpu.pipeline_mode<synchronous>, transform_indices = @transform_6, window_bounds = array<i64: 1, 128>}, {pipeline_mode = #tpu.pipeline_mode<synchronous>, transform_indices = @transform_7, window_bounds = array<i64: 128, 128>}, {pipeline_mode = #tpu.pipeline_mode<synchronous>, transform_indices = @transform_8, window_bounds = array<i64: 1, 128>}, {pipeline_mode = #tpu.pipeline_mode<synchronous>, transform_indices = @transform_9, window_bounds = array<i64: 128, 128>}, {pipeline_mode = #tpu.pipeline_mode<synchronous>, transform_indices = @transform_10, window_bounds = array<i64: 1, 128>}, {transform_indices = @transform_11, window_bounds = array<i64: 16, 128>}]} {
    %c0 = arith.constant 0 : index
    %c0_0 = arith.constant 0 : index
    %0 = vector.load %arg1[%c0, %c0_0] : memref<16x128xf32, #tpu.memory_space<vmem>>, vector<16x128xf32>
    %1 = arith.truncf %0 : vector<16x128xf32> to vector<16x128xbf16>
    %c0_1 = arith.constant 0 : index
    %c0_2 = arith.constant 0 : index
    %2 = vector.load %arg2[%c0_1, %c0_2] : memref<128x128xbf16, #tpu.memory_space<vmem>>, vector<128x128xbf16>
    %cst = arith.constant dense<0.000000e+00> : vector<16x128xf32>
    %3 = tpu.matmul %1, %2, %cst {dimension_numbers = #tpu.dot_dimension_numbers<[1], [0], [0], [1], [0, 0, 1, 1], [], []>} : vector<16x128xbf16>, vector<128x128xbf16>, vector<16x128xf32> -> vector<16x128xf32>
    %c0_3 = arith.constant 0 : index
    %c0_4 = arith.constant 0 : index
    %4 = vector.load %arg3[%c0_3, %c0_4] : memref<1x128xf32, #tpu.memory_space<vmem>>, vector<1x128xf32>
    %5 = vector.broadcast %4 : vector<1x128xf32> to vector<16x128xf32>
    %6 = arith.addf %3, %5 : vector<16x128xf32>
    %7 = arith.truncf %6 : vector<16x128xf32> to vector<16x128xbf16>
    %c0_5 = arith.constant 0 : index
    %c0_6 = arith.constant 0 : index
    %8 = vector.load %arg4[%c0_5, %c0_6] : memref<128x128xbf16, #tpu.memory_space<vmem>>, vector<128x128xbf16>
    %cst_7 = arith.constant dense<0.000000e+00> : vector<16x128xf32>
    %9 = tpu.matmul %7, %8, %cst_7 {dimension_numbers = #tpu.dot_dimension_numbers<[1], [0], [0], [1], [0, 0, 1, 1], [], []>} : vector<16x128xbf16>, vector<128x128xbf16>, vector<16x128xf32> -> vector<16x128xf32>
    %c0_8 = arith.constant 0 : index
    %c0_9 = arith.constant 0 : index
    %10 = vector.load %arg5[%c0_8, %c0_9] : memref<1x128xf32, #tpu.memory_space<vmem>>, vector<1x128xf32>
    %11 = vector.broadcast %10 : vector<1x128xf32> to vector<16x128xf32>
    %12 = arith.addf %9, %11 : vector<16x128xf32>
    %cst_10 = arith.constant 0.000000e+00 : f32
    %13 = vector.broadcast %cst_10 : f32 to vector<16x128xf32>
    %14 = arith.maximumf %12, %13 : vector<16x128xf32>
    %15 = arith.truncf %14 : vector<16x128xf32> to vector<16x128xbf16>
    %c0_11 = arith.constant 0 : index
    %c0_12 = arith.constant 0 : index
    %16 = vector.load %arg6[%c0_11, %c0_12] : memref<128x128xbf16, #tpu.memory_space<vmem>>, vector<128x128xbf16>
    %cst_13 = arith.constant dense<0.000000e+00> : vector<16x128xf32>
    %17 = tpu.matmul %15, %16, %cst_13 {dimension_numbers = #tpu.dot_dimension_numbers<[1], [0], [0], [1], [0, 0, 1, 1], [], []>} : vector<16x128xbf16>, vector<128x128xbf16>, vector<16x128xf32> -> vector<16x128xf32>
    %c0_14 = arith.constant 0 : index
    %c0_15 = arith.constant 0 : index
    %18 = vector.load %arg7[%c0_14, %c0_15] : memref<1x128xf32, #tpu.memory_space<vmem>>, vector<1x128xf32>
    %19 = vector.broadcast %18 : vector<1x128xf32> to vector<16x128xf32>
    %20 = arith.addf %17, %19 : vector<16x128xf32>
    %cst_16 = arith.constant 0.000000e+00 : f32
    %21 = vector.broadcast %cst_16 : f32 to vector<16x128xf32>
    %22 = arith.maximumf %20, %21 : vector<16x128xf32>
    %23 = arith.addf %6, %22 : vector<16x128xf32>
    %24 = arith.truncf %23 : vector<16x128xf32> to vector<16x128xbf16>
    %c0_17 = arith.constant 0 : index
    %c0_18 = arith.constant 0 : index
    %25 = vector.load %arg8[%c0_17, %c0_18] : memref<128x128xbf16, #tpu.memory_space<vmem>>, vector<128x128xbf16>
    %cst_19 = arith.constant dense<0.000000e+00> : vector<16x128xf32>
    %26 = tpu.matmul %24, %25, %cst_19 {dimension_numbers = #tpu.dot_dimension_numbers<[1], [0], [0], [1], [0, 0, 1, 1], [], []>} : vector<16x128xbf16>, vector<128x128xbf16>, vector<16x128xf32> -> vector<16x128xf32>
    %c0_20 = arith.constant 0 : index
    %c0_21 = arith.constant 0 : index
    %27 = vector.load %arg9[%c0_20, %c0_21] : memref<1x128xf32, #tpu.memory_space<vmem>>, vector<1x128xf32>
    %28 = vector.broadcast %27 : vector<1x128xf32> to vector<16x128xf32>
    %29 = arith.addf %26, %28 : vector<16x128xf32>
    %cst_22 = arith.constant 0.000000e+00 : f32
    %30 = vector.broadcast %cst_22 : f32 to vector<16x128xf32>
    %31 = arith.maximumf %29, %30 : vector<16x128xf32>
    %32 = arith.truncf %31 : vector<16x128xf32> to vector<16x128xbf16>
    %c0_23 = arith.constant 0 : index
    %c0_24 = arith.constant 0 : index
    %33 = vector.load %arg10[%c0_23, %c0_24] : memref<128x128xbf16, #tpu.memory_space<vmem>>, vector<128x128xbf16>
    %cst_25 = arith.constant dense<0.000000e+00> : vector<16x128xf32>
    %34 = tpu.matmul %32, %33, %cst_25 {dimension_numbers = #tpu.dot_dimension_numbers<[1], [0], [0], [1], [0, 0, 1, 1], [], []>} : vector<16x128xbf16>, vector<128x128xbf16>, vector<16x128xf32> -> vector<16x128xf32>
    %c0_26 = arith.constant 0 : index
    %c0_27 = arith.constant 0 : index
    %35 = vector.load %arg11[%c0_26, %c0_27] : memref<1x128xf32, #tpu.memory_space<vmem>>, vector<1x128xf32>
    %36 = vector.broadcast %35 : vector<1x128xf32> to vector<16x128xf32>
    %37 = arith.addf %34, %36 : vector<16x128xf32>
    %cst_28 = arith.constant 0.000000e+00 : f32
    %38 = vector.broadcast %cst_28 : f32 to vector<16x128xf32>
    %39 = arith.maximumf %37, %38 : vector<16x128xf32>
    %40 = arith.addf %23, %39 : vector<16x128xf32>
    %41 = arith.truncf %40 : vector<16x128xf32> to vector<16x128xbf16>
    %c0_29 = arith.constant 0 : index
    %c0_30 = arith.constant 0 : index
    %42 = vector.load %arg12[%c0_29, %c0_30] : memref<16x128xbf16, #tpu.memory_space<vmem>>, vector<16x128xbf16>
    tpu.vector_store %arg12[%c0_29, %c0_30], %41 {strides = array<i32>} : memref<16x128xbf16, #tpu.memory_space<vmem>>, vector<16x128xbf16>,
    return
  }
  func.func @transform_0(%arg0: i32) -> (i32, i32) {
    %c0_i32 = arith.constant 0 : i32
    %c0_i32_0 = arith.constant 0 : i32
    return %arg0, %c0_i32 : i32, i32
  }
  func.func @transform_1(%arg0: i32) -> (i32, i32) {
    %c0_i32 = arith.constant 0 : i32
    %c0_i32_0 = arith.constant 0 : i32
    %c0_i32_1 = arith.constant 0 : i32
    return %c0_i32, %c0_i32_0 : i32, i32
  }
  func.func @transform_2(%arg0: i32) -> (i32, i32) {
    %c0_i32 = arith.constant 0 : i32
    %c0_i32_0 = arith.constant 0 : i32
    %c0_i32_1 = arith.constant 0 : i32
    return %c0_i32, %c0_i32_0 : i32, i32
  }
  func.func @transform_3(%arg0: i32) -> (i32, i32) {
    %c0_i32 = arith.constant 0 : i32
    %c0_i32_0 = arith.constant 0 : i32
    %c0_i32_1 = arith.constant 0 : i32
    return %c0_i32, %c0_i32_0 : i32, i32
  }
  func.func @transform_4(%arg0: i32) -> (i32, i32) {
    %c0_i32 = arith.constant 0 : i32
    %c0_i32_0 = arith.constant 0 : i32
    %c0_i32_1 = arith.constant 0 : i32
    return %c0_i32, %c0_i32_0 : i32, i32
  }
  func.func @transform_5(%arg0: i32) -> (i32, i32) {
    %c0_i32 = arith.constant 0 : i32
    %c0_i32_0 = arith.constant 0 : i32
    %c0_i32_1 = arith.constant 0 : i32
    return %c0_i32, %c0_i32_0 : i32, i32
  }
  func.func @transform_6(%arg0: i32) -> (i32, i32) {
    %c0_i32 = arith.constant 0 : i32
    %c0_i32_0 = arith.constant 0 : i32
    %c0_i32_1 = arith.constant 0 : i32
    return %c0_i32, %c0_i32_0 : i32, i32
  }
  func.func @transform_7(%arg0: i32) -> (i32, i32) {
    %c0_i32 = arith.constant 0 : i32
    %c0_i32_0 = arith.constant 0 : i32
    %c0_i32_1 = arith.constant 0 : i32
    return %c0_i32, %c0_i32_0 : i32, i32
  }
  func.func @transform_8(%arg0: i32) -> (i32, i32) {
    %c0_i32 = arith.constant 0 : i32
    %c0_i32_0 = arith.constant 0 : i32
    %c0_i32_1 = arith.constant 0 : i32
    return %c0_i32, %c0_i32_0 : i32, i32
  }
  func.func @transform_9(%arg0: i32) -> (i32, i32) {
    %c0_i32 = arith.constant 0 : i32
    %c0_i32_0 = arith.constant 0 : i32
    %c0_i32_1 = arith.constant 0 : i32
    return %c0_i32, %c0_i32_0 : i32, i32
  }
  func.func @transform_10(%arg0: i32) -> (i32, i32) {
    %c0_i32 = arith.constant 0 : i32
    %c0_i32_0 = arith.constant 0 : i32
    %c0_i32_1 = arith.constant 0 : i32
    return %c0_i32, %c0_i32_0 : i32, i32
  }
  func.func @transform_11(%arg0: i32) -> (i32, i32) {
    %c0_i32 = arith.constant 0 : i32
    %c0_i32_0 = arith.constant 0 : i32
    return %arg0, %c0_i32 : i32, i32
  }
}

</mosaic_0001>

<bundles_post_ra>
// kernel: tpu_custom_call.1
= control target key start
LH: loop header
LB: loop body
LE: loop exit
PB: predicated region body
PF: predicated region fallthrough
CT: control target
= control target key end

     0   :  { %16 = vsyncpa [#allocation3], 0  ;;  %s1395_s0 = inlined_call_operand.hbm [shape: f32[16,128], index: 0, kind: input, shape index: {}]   ;;  %s1396_s1 = inlined_call_operand.hbm [shape: bf16[128,128], index: 1, kind: input, shape index: {}]   ;;  %s1397_s2 = inlined_call_operand.vmem [shape: f32[1,128], index: 2, kind: input, shape index: {}]   ;;  %s1398_s3 = inlined_call_operand.hbm [shape: bf16[128,128], index: 3, kind: input, shape index: {}]   ;;  %s1399_s4 = inlined_call_operand.vmem [shape: f32[1,128], index: 4, kind: input, shape index: {}]   ;;  %s1400_s5 = inlined_call_operand.hbm [shape: bf16[128,128], index: 5, kind: input, shape index: {}]   ;;  %s1401_s6 = inlined_call_operand.vmem [shape: f32[1,128], index: 6, kind: input, shape index: {}]   ;;  %s1402_s7 = inlined_call_operand.hbm [shape: bf16[128,128], index: 7, kind: input, shape index: {}]   ;;  %s1403_s8 = inlined_call_operand.vmem [shape: f32[1,128], index: 8, kind: input, shape index: {}]   ;;  %s1404_s9 = inlined_call_operand.hbm [shape: bf16[128,128], index: 9, kind: input, shape index: {}]   ;;  %s1405_s10 = inlined_call_operand.vmem [shape: f32[1,128], index: 10, kind: input, shape index: {}]   ;;  %s1406_s11 = inlined_call_operand.hbm [shape: bf16[16,128], index: 11, kind: output, shape index: {}]  }
   0x1   :  { %17 = vsyncpa [#allocation6], 0 }
   0x2   :  { %18 = vsyncpa [#allocation9], 0 }
   0x3   :  { %19 = vsyncpa [#allocation12], 0 }
   0x4   :  { %20 = vsyncpa [#allocation4], 0  ;;  %s1147_s17 = smov [#allocation5]   ;;  %s983_s21 = scalar_lea.hbm %s1396_s1, 1024 }
   0x5   :  { %s38_s18 = sshll.u32 %s1147_s17, 4  ;;  %p984_p0 = scmp.ne.s32.totalorder %s1396_s1, %s983_s21  ;;  %s39_s18 = int_to_ptr.vmem [resolvable:$true] %s38_s18 }
   0x6   :  { %p987_p1 = scmp.lt.u32.totalorder %s983_s21, %s1396_s1 }
   0x8   :  { %p989_p2 = pnand %p987_p1, %p984_p0 }
   0xa   :  { %992 = shalt.err (!%p989_p2)
}
   0xb   :  { %s993_s26 = scalar_lea.vmem %s39_s18, 1024  ;;  %p998_p4 = scmp.lt.s32.totalorder %s39_s18, %s39_s18 }
   0xc   :  { %p994_p3 = scmp.ne.s32.totalorder %s39_s18, %s993_s26  ;;  %p999_p5 = scmp.lt.s32.totalorder %s993_s26, %s993_s26 }
   0xe   :  { %p1000_p6 = por %p999_p5, %p998_p4 }
  0x10   :  { %p1001_p7 = pnand %p1000_p6, %p994_p3 }
  0x12   :  { %1004 = shalt.err (!%p1001_p7)
}
  0x13   :  { %s1148_s27 = smov 64   ;;  %s1149_s28 = smov 4  }
  0x14   :  { %44 = dma.hbm_to_vmem [thread:$0]  %s1396_s1, 1024, %s39_s18, [#allocation6], %s1148_s27, %s1148_s27, %s1149_s28  }
  0x15   :  { %s1150_s12 = smov [#allocation8]   ;;  %s1151_s14 = smov [#allocation2]  }
  0x16   :  { %s66_s13 = sshll.u32 %s1150_s12, 4  ;;  %s26_s15 = sshll.u32 %s1151_s14, 4  ;;  %s67_s13 = int_to_ptr.vmem [resolvable:$true] %s66_s13  ;;  %s27_s15 = int_to_ptr.vmem [resolvable:$true] %s26_s15 }
  0x17   :  { %s1005_s19 = scalar_lea.hbm %s1400_s5, 1024 }
  0x18   :  { %p1006_p8 = scmp.ne.s32.totalorder %s1400_s5, %s1005_s19  ;;  %p1009_p9 = scmp.lt.u32.totalorder %s1005_s19, %s1400_s5 }
  0x1a   :  { %p1011_p10 = pnand %p1009_p9, %p1006_p8 }
  0x1c   :  { %1014 = shalt.err (!%p1011_p10)
}
  0x1d   :  { %s1015_s1 = scalar_lea.vmem %s67_s13, 1024  ;;  %p1020_p12 = scmp.lt.s32.totalorder %s67_s13, %s67_s13 }
  0x1e   :  { %p1016_p11 = scmp.ne.s32.totalorder %s67_s13, %s1015_s1  ;;  %p1021_p13 = scmp.lt.s32.totalorder %s1015_s1, %s1015_s1 }
  0x20   :  { %p1022_p0 = por %p1021_p13, %p1020_p12 }
  0x22   :  { %p1023_p1 = pnand %p1022_p0, %p1016_p11 }
  0x24   :  { %1026 = shalt.err (!%p1023_p1)
}
  0x25   :  { %72 = dma.hbm_to_vmem [thread:$0]  %s1400_s5, 1024, %s67_s13, [#allocation9], %s1148_s27, %s1148_s27, %s1149_s28  }
  0x26   :  { %s1027_s29 = scalar_lea.hbm %s1395_s0, 256 }
  0x27   :  { %p1028_p2 = scmp.ne.s32.totalorder %s1395_s0, %s1027_s29  ;;  %p1031_p3 = scmp.lt.u32.totalorder %s1027_s29, %s1395_s0 }
  0x29   :  { %p1033_p4 = pnand %p1031_p3, %p1028_p2 }
  0x2b   :  { %1036 = shalt.err (!%p1033_p4)
}
  0x2c   :  { %s1037_s17 = scalar_lea.vmem %s27_s15, 256  ;;  %p1042_p6 = scmp.lt.s32.totalorder %s27_s15, %s27_s15 }
  0x2d   :  { %p1038_p5 = scmp.ne.s32.totalorder %s27_s15, %s1037_s17  ;;  %p1043_p7 = scmp.lt.s32.totalorder %s1037_s17, %s1037_s17 }
  0x2f   :  { %p1044_p8 = por %p1043_p7, %p1042_p6 }
  0x31   :  { %p1045_p9 = pnand %p1044_p8, %p1038_p5 }
  0x33   :  { %1048 = shalt.err (!%p1045_p9)
}
  0x34   :  { %s1152_s5 = smov 128   ;;  %s1153_s13 = smov 8  }
  0x35   :  { %32 = dma.hbm_to_vmem [thread:$0]  %s1395_s0, 256, %s27_s15, [#allocation3], %s1152_s5, %s1152_s5, %s1153_s13  }
  0x36   :  { %s1154_s21 = smov [#allocation7]   ;;  %s1155_s23 = smov [#allocation10]  }
  0x37   :  { %s52_s22 = sshll.u32 %s1154_s21, 4  ;;  %s80_s1 = sshll.u32 %s1155_s23, 4  ;;  %s53_s22 = int_to_ptr.vmem [resolvable:$true] %s52_s22  ;;  %s81_s1 = int_to_ptr.vmem [resolvable:$true] %s80_s1 }
  0x38   :  { %s1049_s25 = scalar_lea.hbm %s1398_s3, 1024 }
  0x39   :  { %p1050_p10 = scmp.ne.s32.totalorder %s1398_s3, %s1049_s25  ;;  %p1053_p11 = scmp.lt.u32.totalorder %s1049_s25, %s1398_s3 }
  0x3b   :  { %p1055_p12 = pnand %p1053_p11, %p1050_p10 }
  0x3d   :  { %1058 = shalt.err (!%p1055_p12)
}
  0x3e   :  { %s1059_s0 = scalar_lea.vmem %s53_s22, 1024  ;;  %p1064_p0 = scmp.lt.s32.totalorder %s53_s22, %s53_s22 }
  0x3f   :  { %p1060_p13 = scmp.ne.s32.totalorder %s53_s22, %s1059_s0  ;;  %p1065_p1 = scmp.lt.s32.totalorder %s1059_s0, %s1059_s0 }
  0x41   :  { %p1066_p2 = por %p1065_p1, %p1064_p0 }
  0x43   :  { %p1067_p3 = pnand %p1066_p2, %p1060_p13 }
  0x45   :  { %1070 = shalt.err (!%p1067_p3)
}
  0x46   :  { %58 = dma.hbm_to_vmem [thread:$0]  %s1398_s3, 1024, %s53_s22, [#allocation6], %s1148_s27, %s1148_s27, %s1149_s28  }
  0x47   :  { %s1071_s5 = scalar_lea.hbm %s1402_s7, 1024 }
  0x48   :  { %p1072_p4 = scmp.ne.s32.totalorder %s1402_s7, %s1071_s5  ;;  %p1075_p5 = scmp.lt.u32.totalorder %s1071_s5, %s1402_s7 }
  0x4a   :  { %p1077_p6 = pnand %p1075_p5, %p1072_p4 }
  0x4c   :  { %1080 = shalt.err (!%p1077_p6)
}
  0x4d   :  { %s1081_s23 = scalar_lea.vmem %s81_s1, 1024  ;;  %p1086_p8 = scmp.lt.s32.totalorder %s81_s1, %s81_s1 }
  0x4e   :  { %p1082_p7 = scmp.ne.s32.totalorder %s81_s1, %s1081_s23  ;;  %p1087_p9 = scmp.lt.s32.totalorder %s1081_s23, %s1081_s23 }
  0x50   :  { %p1088_p10 = por %p1087_p9, %p1086_p8 }
  0x52   :  { %p1089_p11 = pnand %p1088_p10, %p1082_p7 }
  0x54   :  { %1092 = shalt.err (!%p1089_p11)
}
  0x55   :  { %86 = dma.hbm_to_vmem [thread:$0]  %s1402_s7, 1024, %s81_s1, [#allocation9], %s1148_s27, %s1148_s27, %s1149_s28  }
  0x56   :  { %s1156_s18 = smov [#allocation11]   ;;  %s1093_s29 = scalar_lea.hbm %s1404_s9, 1024 }
  0x57   :  { %s94_s24 = sshll.u32 %s1156_s18, 4  ;;  %p1094_p12 = scmp.ne.s32.totalorder %s1404_s9, %s1093_s29  ;;  %s95_s24 = int_to_ptr.vmem [resolvable:$true] %s94_s24 }
  0x58   :  { %p1097_p13 = scmp.lt.u32.totalorder %s1093_s29, %s1404_s9 }
  0x5a   :  { %p1099_p0 = pnand %p1097_p13, %p1094_p12 }
  0x5c   :  { %1102 = shalt.err (!%p1099_p0)
}
  0x5d   :  { %s1103_s14 = scalar_lea.vmem %s95_s24, 1024  ;;  %p1108_p2 = scmp.lt.s32.totalorder %s95_s24, %s95_s24 }
  0x5e   :  { %p1104_p1 = scmp.ne.s32.totalorder %s95_s24, %s1103_s14  ;;  %p1109_p3 = scmp.lt.s32.totalorder %s1103_s14, %s1103_s14 }
  0x60   :  { %p1110_p4 = por %p1109_p3, %p1108_p2 }
  0x62   :  { %p1111_p5 = pnand %p1110_p4, %p1104_p1 }
  0x64   :  { %1114 = shalt.err (!%p1111_p5)
}
  0x65   :  { %100 = dma.hbm_to_vmem [thread:$0]  %s1404_s9, 1024, %s95_s24, [#allocation12], %s1148_s27, %s1148_s27, %s1149_s28  }
  0x66   :  { %1137 = dma.done.wait [#allocation3], 256  }
  0x67   :  { %1138 = vsyncadd [#allocation3], 4294967040 }
  0x68   :  { %1139 = dma.done.wait [#allocation6], 2048  }
  0x69   :  { %1140 = vsyncadd [#allocation6], 4294965248 }
  0x6a   :  { %1141 = dma.done.wait [#allocation9], 2048  }
  0x6b   :  { %1142 = vsyncadd [#allocation9], 4294965248 }
  0x6c   :  { %1143 = dma.done.wait [#allocation12], 1024  }
  0x6d   :  { %1144 = vsyncadd [#allocation12], 4294966272  ;;  %v1157_v0 = vmov 0.0   ;;  %vm1158_vm0 = vmmov 0   ;;  %v943_v1 = vld [vmem:[#allocation5] sm:$0xff]   ;;  %v944_v2 = vld [vmem:[#allocation5 + $0x8] sm:$0xff]  }
  0x6e   :  { %830 = vmatprep.subr.bf16.mxu0 %v1157_v0  ;;  %846 = vmatprep.mubr.msk.bf16.mxu0 %vm1158_vm0, %v1157_v0  ;;  %v945_v3 = vld [vmem:[#allocation5 + $0x10] sm:$0xff]   ;;  %v951_v4 = vld [vmem:[#allocation7] sm:$0xff]   ;;  %v946_v5 = vld [vmem:[#allocation5 + $0x18] sm:$0xff]  }
  0x6f   :  { %850 = vmatprep.subr.bf16.mxu1 %v1157_v0  ;;  %866 = vmatprep.mubr.msk.bf16.mxu1 %vm1158_vm0, %v1157_v0  ;;  %v952_v6 = vld [vmem:[#allocation7 + $0x8] sm:$0xff]   ;;  %v947_v7 = vld [vmem:[#allocation5 + $0x20] sm:$0xff]   ;;  %v953_v8 = vld [vmem:[#allocation7 + $0x10] sm:$0xff]  }
  0x70   :  { %831 = vmatpush3.bf16.msra.mxu0 %v943_v1  ;;  %851 = vmatpush3.bf16.msra.mxu1 %v951_v4  ;;  %v948_v9 = vld [vmem:[#allocation5 + $0x28] sm:$0xff]   ;;  %v954_v10 = vld [vmem:[#allocation7 + $0x18] sm:$0xff]   ;;  %v949_v11 = vld [vmem:[#allocation5 + $0x30] sm:$0xff]  }
  0x71   :  { %832 = vmatprep.subr.bf16.mxu0 %v1157_v0  ;;  %852 = vmatprep.subr.bf16.mxu1 %v1157_v0  ;;  %v955_v12 = vld [vmem:[#allocation7 + $0x20] sm:$0xff]   ;;  %v950_v13 = vld [vmem:[#allocation5 + $0x38] sm:$0xff]   ;;  %v122_v14 = vld [vmem:[#allocation2] sm:$0xff] }
  0x72   :  { %v123_v15 = vld [vmem:[#allocation2 + $0x8] sm:$0xff]  ;;  %v956_v16 = vld [vmem:[#allocation7 + $0x28] sm:$0xff]   ;;  %v957_v18 = vld [vmem:[#allocation7 + $0x30] sm:$0xff]  }
  0x73   :  { %v124_v17 = vpack.c.bf16 %v123_v15, %v122_v14  ;;  %v958_v19 = vld [vmem:[#allocation7 + $0x38] sm:$0xff]   ;;  %v959_v20 = vld [vmem:[#allocation8] sm:$0xff]   ;;  %v960_v21 = vld [vmem:[#allocation8 + $0x8] sm:$0xff]  }
  0x74   :  { %833 = vmatpush3.bf16.msra.mxu0 %v944_v2  ;;  %853 = vmatpush3.bf16.msra.mxu1 %v952_v6  ;;  %v961_v22 = vld [vmem:[#allocation8 + $0x10] sm:$0xff]   ;;  %v962_v23 = vld [vmem:[#allocation8 + $0x18] sm:$0xff]   ;;  %v963_v24 = vld [vmem:[#allocation8 + $0x20] sm:$0xff]  }
  0x75   :  { %834 = vmatprep.subr.bf16.mxu0 %v1157_v0  ;;  %854 = vmatprep.subr.bf16.mxu1 %v1157_v0  ;;  %v964_v25 = vld [vmem:[#allocation8 + $0x28] sm:$0xff]   ;;  %v731_v26 = vld [vmem:[%s1397_s2] ss:$0 sm:$0xff]  ;;  %v966_v35 = vld [vmem:[#allocation8 + $0x38] sm:$0xff]  }
  0x76   :  { %v965_v34 = vld [vmem:[#allocation8 + $0x30] sm:$0xff]   ;;  %v967_v36 = vld [vmem:[#allocation10] sm:$0xff]   ;;  %v968_v37 = vld [vmem:[#allocation10 + $0x8] sm:$0xff]  }
  0x77   :  { %v969_v38 = vld [vmem:[#allocation10 + $0x10] sm:$0xff]   ;;  %v970_v39 = vld [vmem:[#allocation10 + $0x18] sm:$0xff]   ;;  %v971_v40 = vld [vmem:[#allocation10 + $0x20] sm:$0xff]  }
  0x78   :  { %835 = vmatpush3.bf16.msra.mxu0 %v945_v3  ;;  %855 = vmatpush3.bf16.msra.mxu1 %v953_v8  ;;  %v740_v41 = vld [vmem:[%s1399_s4] ss:$0 sm:$0xff]  ;;  %v972_v51 = vld [vmem:[#allocation10 + $0x28] sm:$0xff]   ;;  %v974_v53 = vld [vmem:[#allocation10 + $0x38] sm:$0xff]  }
  0x79   :  { %836 = vmatprep.subr.bf16.mxu0 %v1157_v0  ;;  %856 = vmatprep.subr.bf16.mxu1 %v1157_v0  ;;  %v973_v52 = vld [vmem:[#allocation10 + $0x30] sm:$0xff]   ;;  %v975_v54 = vld [vmem:[#allocation11] sm:$0xff]   ;;  %v976_v55 = vld [vmem:[#allocation11 + $0x8] sm:$0xff]  }
  0x7a   :  { %v977_v56 = vld [vmem:[#allocation11 + $0x10] sm:$0xff]   ;;  %v978_v57 = vld [vmem:[#allocation11 + $0x18] sm:$0xff]   ;;  %v979_v58 = vld [vmem:[#allocation11 + $0x20] sm:$0xff]  }
  0x7b   :  { %v980_v59 = vld [vmem:[#allocation11 + $0x28] sm:$0xff]   ;;  %v749_v60 = vld [vmem:[%s1401_s6] ss:$0 sm:$0xff] }
  0x7c   :  { %837 = vmatpush3.bf16.msra.mxu0 %v946_v5  ;;  %857 = vmatpush3.bf16.msra.mxu1 %v954_v10  ;;  %v982_v10 = vld [vmem:[#allocation11 + $0x38] sm:$0xff]  }
  0x7d   :  { %838 = vmatprep.subr.bf16.mxu0 %v1157_v0  ;;  %858 = vmatprep.subr.bf16.mxu1 %v1157_v0 }
  0x80   :  { %839 = vmatpush3.bf16.msra.mxu0 %v947_v7  ;;  %859 = vmatpush3.bf16.msra.mxu1 %v955_v12 }
  0x81   :  { %840 = vmatprep.subr.bf16.mxu0 %v1157_v0  ;;  %860 = vmatprep.subr.bf16.mxu1 %v1157_v0 }
  0x84   :  { %841 = vmatpush3.bf16.msra.mxu0 %v948_v9  ;;  %861 = vmatpush3.bf16.msra.mxu1 %v956_v16  ;;  %v981_v9 = vld [vmem:[#allocation11 + $0x30] sm:$0xff]  }
  0x85   :  { %842 = vmatprep.subr.bf16.mxu0 %v1157_v0  ;;  %862 = vmatprep.subr.bf16.mxu1 %v1157_v0 }
  0x88   :  { %843 = vmatpush3.bf16.msra.mxu0 %v949_v11  ;;  %863 = vmatpush3.bf16.msra.mxu1 %v957_v18  ;;  %v758_v11 = vld [vmem:[%s1403_s8] ss:$0 sm:$0xff]  ;;  %s1159_s8 = smov [#allocation13]  }
  0x89   :  { %844 = vmatprep.subr.bf16.mxu0 %v1157_v0  ;;  %864 = vmatprep.subr.bf16.mxu1 %v1157_v0  ;;  %s716_s21 = sshll.u32 %s1159_s8, 4  ;;  %s717_s21 = int_to_ptr.vmem [resolvable:$true] %s716_s21 }
  0x8a   :  { %s1115_s23 = scalar_lea.vmem %s717_s21, 128  ;;  %p1120_p7 = scmp.lt.s32.totalorder %s717_s21, %s717_s21 }
  0x8b   :  { %p1116_p6 = scmp.ne.s32.totalorder %s717_s21, %s1115_s23  ;;  %p1121_p8 = scmp.lt.s32.totalorder %s1115_s23, %s1115_s23 }
  0x8c   :  { %845 = vmatpush3.bf16.msra.mxu0 %v950_v13  ;;  %865 = vmatpush3.bf16.msra.mxu1 %v958_v19 }
  0x8d   :  { %870 = vmatprep.subr.bf16.mxu0 %v1157_v0  ;;  %890 = vmatprep.subr.bf16.mxu1 %v1157_v0  ;;  %p1122_p9 = por %p1121_p8, %p1120_p7 }
  0x8f   :  { %847 = vmatmul.mubr.bf16.vlgmr.msra.gmra.mrb[0].mxu0 %v124_v17  ;;  %p1123_p10 = pnand %p1122_p9, %p1116_p6 }
  0x90   :  { %886 = vmatprep.mubr.msk.bf16.mxu0 %vm1158_vm0, %v1157_v0  ;;  %871 = vmatpush3.bf16.msra.mxu0 %v959_v20 }
  0x91   :  { %872 = vmatprep.subr.bf16.mxu0 %v1157_v0 }
  0x94   :  { %873 = vmatpush3.bf16.msra.mxu0 %v960_v21 }
  0x95   :  { %874 = vmatprep.subr.bf16.mxu0 %v1157_v0 }
  0x98   :  { %875 = vmatpush3.bf16.msra.mxu0 %v961_v22 }
  0x99   :  { %876 = vmatprep.subr.bf16.mxu0 %v1157_v0 }
  0x9c   :  { %877 = vmatpush3.bf16.msra.mxu0 %v962_v23 }
  0x9d   :  { %878 = vmatprep.subr.bf16.mxu0 %v1157_v0 }
  0xa0   :  { %879 = vmatpush3.bf16.msra.mxu0 %v963_v24 }
  0xa1   :  { %880 = vmatprep.subr.bf16.mxu0 %v1157_v0 }
  0xa4   :  { %881 = vmatpush3.bf16.msra.mxu0 %v964_v25 }
  0xa5   :  { %882 = vmatprep.subr.bf16.mxu0 %v1157_v0 }
  0xa8   :  { %883 = vmatpush3.bf16.msra.mxu0 %v965_v34 }
  0xa9   :  { %884 = vmatprep.subr.bf16.mxu0 %v1157_v0 }
  0xac   :  { %885 = vmatpush3.bf16.msra.mxu0 %v966_v35 }
  0xad   :  { %910 = vmatprep.subr.bf16.mxu0 %v1157_v0 }
 0x162   :  { %v230_v27 = vpop.f32.mrb[0].mxu0 }
 0x163   :  { %v848_v28 = vpop.f32.mrb[1].mxu0  ;;  %v1340_v30 = vadd.f32 %v731_v26, %v230_v27 }
 0x164   :  { %v233_v29 = vpop.f32.mrb[2].mxu0 }
 0x165   :  { %v1342_v31 = vadd.f32 %v731_v26, %v233_v29  ;;  %v849_v32 = vpop.f32.mrb[3].mxu0 }
 0x167   :  { %v237_v33 = vpack.c.bf16 %v1342_v31, %v1340_v30 }
 0x169   :  { %867 = vmatmul.mubr.bf16.vlgmr.msra.gmra.mrb[0].mxu1 %v237_v33 }
 0x16a   :  { %906 = vmatprep.mubr.msk.bf16.mxu1 %vm1158_vm0, %v1157_v0  ;;  %891 = vmatpush3.bf16.msra.mxu1 %v967_v36 }
 0x16b   :  { %892 = vmatprep.subr.bf16.mxu1 %v1157_v0 }
 0x16e   :  { %893 = vmatpush3.bf16.msra.mxu1 %v968_v37 }
 0x16f   :  { %894 = vmatprep.subr.bf16.mxu1 %v1157_v0 }
 0x172   :  { %895 = vmatpush3.bf16.msra.mxu1 %v969_v38 }
 0x173   :  { %896 = vmatprep.subr.bf16.mxu1 %v1157_v0 }
 0x176   :  { %897 = vmatpush3.bf16.msra.mxu1 %v970_v39 }
 0x177   :  { %898 = vmatprep.subr.bf16.mxu1 %v1157_v0 }
 0x17a   :  { %899 = vmatpush3.bf16.msra.mxu1 %v971_v40 }
 0x17b   :  { %900 = vmatprep.subr.bf16.mxu1 %v1157_v0 }
 0x17e   :  { %901 = vmatpush3.bf16.msra.mxu1 %v972_v51 }
 0x17f   :  { %902 = vmatprep.subr.bf16.mxu1 %v1157_v0 }
 0x182   :  { %903 = vmatpush3.bf16.msra.mxu1 %v973_v52 }
 0x183   :  { %904 = vmatprep.subr.bf16.mxu1 %v1157_v0 }
 0x186   :  { %905 = vmatpush3.bf16.msra.mxu1 %v974_v53 }
 0x23c   :  { %v343_v42 = vpop.f32.mrb[0].mxu1 }
 0x23d   :  { %v344_v43 = vadd.f32 %v740_v41, %v343_v42  ;;  %v868_v44 = vpop.f32.mrb[1].mxu1 }
 0x23e   :  { %v346_v45 = vpop.f32.mrb[2].mxu1 }
 0x23f   :  { %v347_v46 = vadd.f32 %v740_v41, %v346_v45  ;;  %v869_v47 = vpop.f32.mrb[3].mxu1  ;;  %v350_v48 = vmax.f32 %v344_v43, 0.0 }
 0x241   :  { %v351_v49 = vmax.f32 %v347_v46, 0.0 }
 0x243   :  { %v352_v50 = vpack.c.bf16 %v351_v49, %v350_v48 }
 0x245   :  { %887 = vmatmul.mubr.bf16.vlgmr.msra.gmra.mrb[4].mxu0 %v352_v50 }
 0x246   :  { %926 = vmatprep.mubr.msk.bf16.mxu0 %vm1158_vm0, %v1157_v0  ;;  %911 = vmatpush3.bf16.msra.mxu0 %v975_v54 }
 0x247   :  { %912 = vmatprep.subr.bf16.mxu0 %v1157_v0 }
 0x24a   :  { %913 = vmatpush3.bf16.msra.mxu0 %v976_v55 }
 0x24b   :  { %914 = vmatprep.subr.bf16.mxu0 %v1157_v0 }
 0x24e   :  { %915 = vmatpush3.bf16.msra.mxu0 %v977_v56 }
 0x24f   :  { %916 = vmatprep.subr.bf16.mxu0 %v1157_v0 }
 0x252   :  { %917 = vmatpush3.bf16.msra.mxu0 %v978_v57 }
 0x253   :  { %918 = vmatprep.subr.bf16.mxu0 %v1157_v0 }
 0x256   :  { %919 = vmatpush3.bf16.msra.mxu0 %v979_v58 }
 0x257   :  { %920 = vmatprep.subr.bf16.mxu0 %v1157_v0 }
 0x25a   :  { %921 = vmatpush3.bf16.msra.mxu0 %v980_v59 }
 0x25b   :  { %922 = vmatprep.subr.bf16.mxu0 %v1157_v0 }
 0x25e   :  { %923 = vmatpush3.bf16.msra.mxu0 %v981_v9 }
 0x25f   :  { %924 = vmatprep.subr.bf16.mxu0 %v1157_v0  ;;  %v767_v0 = vld [vmem:[%s1405_s10] ss:$0 sm:$0xff] }
 0x262   :  { %925 = vmatpush3.bf16.msra.mxu0 %v982_v10 }
 0x318   :  { %v458_v61 = vpop.f32.mrb[4].mxu0 }
 0x319   :  { %v459_v62 = vadd.f32 %v749_v60, %v458_v61  ;;  %v888_v63 = vpop.f32.mrb[5].mxu0 }
 0x31a   :  { %v461_v1 = vpop.f32.mrb[6].mxu0 }
 0x31b   :  { %v465_v2 = vmax.f32 %v459_v62, 0.0  ;;  %v462_v3 = vadd.f32 %v749_v60, %v461_v1  ;;  %v889_v4 = vpop.f32.mrb[7].mxu0 }
 0x31d   :  { %v466_v5 = vmax.f32 %v462_v3, 0.0  ;;  %v467_v6 = vadd.f32 %v465_v2, %v1340_v30 }
 0x31f   :  { %v468_v7 = vadd.f32 %v466_v5, %v1342_v31 }
 0x321   :  { %v469_v8 = vpack.c.bf16 %v468_v7, %v467_v6 }
 0x323   :  { %907 = vmatmul.mubr.bf16.vlgmr.msra.gmra.mrb[4].mxu1 %v469_v8 }
 0x3f6   :  { %v575_v12 = vpop.f32.mrb[4].mxu1 }
 0x3f7   :  { %v576_v13 = vadd.f32 %v758_v11, %v575_v12  ;;  %v908_v14 = vpop.f32.mrb[5].mxu1 }
 0x3f8   :  { %v578_v15 = vpop.f32.mrb[6].mxu1 }
 0x3f9   :  { %v579_v16 = vadd.f32 %v758_v11, %v578_v15  ;;  %v909_v17 = vpop.f32.mrb[7].mxu1  ;;  %v582_v18 = vmax.f32 %v576_v13, 0.0 }
 0x3fb   :  { %v583_v19 = vmax.f32 %v579_v16, 0.0 }
 0x3fd   :  { %v584_v20 = vpack.c.bf16 %v583_v19, %v582_v18 }
 0x3ff   :  { %927 = vmatmul.mubr.bf16.vlgmr.msra.gmra.mrb[8].mxu0 %v584_v20 }
 0x4d2   :  { %v690_v21 = vpop.f32.mrb[8].mxu0 }
 0x4d3   :  { %v691_v22 = vadd.f32 %v767_v0, %v690_v21  ;;  %v928_v23 = vpop.f32.mrb[9].mxu0 }
 0x4d4   :  { %v693_v24 = vpop.f32.mrb[10].mxu0 }
 0x4d5   :  { %v697_v25 = vmax.f32 %v691_v22, 0.0  ;;  %v694_v26 = vadd.f32 %v767_v0, %v693_v24  ;;  %v929_v27 = vpop.f32.mrb[11].mxu0 }
 0x4d7   :  { %v698_v28 = vmax.f32 %v694_v26, 0.0  ;;  %v699_v29 = vadd.f32 %v697_v25, %v467_v6 }
 0x4d9   :  { %v700_v30 = vadd.f32 %v698_v28, %v468_v7 }
 0x4db   :  { %v783_v31 = vpack.c.bf16 %v700_v30, %v699_v29 }
 0x4dd   :  { %784 = vst [vmem:[#allocation13] sm:$0xff] %v783_v31  }
 0x4de   :  { %1126 = shalt.err (!%p1123_p10)
}
 0x4df   :  { %s1127_s22 = scalar_lea.hbm %s1406_s11, 128 }
 0x4e0   :  { %p1128_p11 = scmp.ne.s32.totalorder %s1406_s11, %s1127_s22  ;;  %p1131_p12 = scmp.lt.u32.totalorder %s1127_s22, %s1406_s11 }
 0x4e2   :  { %p1133_p13 = pnand %p1131_p12, %p1128_p11 }
 0x4e4   :  { %1136 = shalt.err (!%p1133_p13)
}
 0x4e5   :  { %722 = dma.vmem_to_hbm [thread:$0]  %s717_s21, 128, %s1406_s11, [#allocation4], %s1148_s27, %s1148_s27, %s1149_s28  }
 0x4e6   :  { %1145 = dma.done.wait [#allocation4], 128  }
 0x4e7   :  { %1146 = vsyncadd [#allocation4], 4294967168 }
 0x4e8   :  { %726 = vsyncpa [#allocation3], 1 }
 0x4e9   :  { %727 = vsyncpa [#allocation6], 1 }
 0x4ea   :  { %728 = vsyncpa [#allocation9], 1 }
 0x4eb   :  { %729 = vsyncpa [#allocation12], 1 }
 0x4ec   :  { %730 = vsyncpa [#allocation4], 1 }

</bundles_post_ra>
